<compile_context>
chip_gen: v7x
topology: tpu7x:2x2x1
jax: 0.10.0
libtpu: 0.0.40
codegen_flags: <defaults>
</compile_context>

<pallas_src>
import functools

import jax
import jax.numpy as jnp
from jax import lax
from jax.experimental import pallas as pl
from jax.experimental.pallas import tpu as pltpu

LANE = 128
_VMEM_LIMIT = 48 * 1024 * 1024         # scoped VMEM: fine on v5e/v6e (128 MiB phys) and v7x (64 MiB)
_A_BLOCK_BYTES = 8 * 1024 * 1024       # budget for the double-buffered int8 A block
_YL_RESIDENT_BYTES = 16 * 1024 * 1024  # budget for the resident (single-buffered) x@W_l panel


def _round_up(v, m):
    return ((v + m - 1) // m) * m


def _pad2d(a, rows, cols):
    r, c = a.shape
    return jnp.pad(a, ((0, rows - r), (0, cols - c)))


def _pick_tiles(n_pad):
    """Pick (tm, tk) as divisors of n_pad.

    tm: largest tile that still gives >= 4 row tiles (so the "parallel" grid
        axis feeds both v7x TensorCores and keeps the pipeline busy).
    tk: as large as possible (>= 128, up to 4096) while the double-buffered
        int8 A block stays within budget -> amortizes per-grid-step overhead.
    """
    tm = 32
    for cand in (1024, 512, 256, 128, 64, 32):
        if n_pad % cand == 0 and n_pad // cand >= 4:
            tm = cand
            break
    tk = LANE
    for cand in (4096, 2048, 1024, 512, 256, 128):
        if n_pad % cand == 0 and 2 * tm * cand <= _A_BLOCK_BYTES:
            tk = cand
            break
    return tm, tk


# ---------------------------------------------------------------------------
# Pallas kernels
# ---------------------------------------------------------------------------

def _proj_kernel(x_ref, w_ref, b_ref, o_ref):
    """p_tile = x_tile @ [W_l | W_r] + [0 | b]   (single MXU call, f32 acc)."""
    acc = jnp.dot(x_ref[...], w_ref[...], preferred_element_type=jnp.float32)
    o_ref[...] = (acc + b_ref[...]).astype(o_ref.dtype)


def _agg_kernel(a_ref, yl_ref, yr_ref, inv_deg_ref, o_ref, acc_ref, *,
                activation, c_out_valid, tk, yl_resident):
    """out = inv_deg * sum_k A_cnt[i,k] @ (xW_l)[k] + (xW_r + b)[i]  (+ epilogue).

    a_ref      : (tm, tk)  int8 edge-count adjacency block
    yl_ref     : (n_pad, Cp) resident panel of x @ W_l   (if yl_resident)
                 (tk, Cp)    per-k block of x @ W_l      (otherwise)
    yr_ref     : (tm, Cp)  bf16 row tile of x @ W_r + b
    inv_deg_ref: (tm, 1)   f32 1/in_degree
    o_ref      : (tm, Cp)  output tile
    acc_ref    : (tm, Cp)  f32 VMEM accumulator across the K grid axis
    """
    k = pl.program_id(1)

    @pl.when(k == 0)
    def _():
        acc_ref[...] = jnp.zeros_like(acc_ref)

    a = a_ref[...].astype(jnp.bfloat16)           # small exact int counts
    if yl_resident:
        start = pl.multiple_of(k * tk, tk)
        yl = yl_ref[pl.ds(start, tk), :]          # slice resident VMEM panel
    else:
        yl = yl_ref[...]
    acc_ref[...] += jnp.dot(a, yl, preferred_element_type=jnp.float32)

    @pl.when(k == pl.num_programs(1) - 1)
    def _():
        out = acc_ref[...] * inv_deg_ref[...] + yr_ref[...].astype(jnp.float32)
        if activation == "relu":
            out = jnp.maximum(out, 0.0)
        elif activation == "log_softmax":
            # mask padded class columns, then row-wise log_softmax
            col = lax.broadcasted_iota(jnp.int32, out.shape, 1)
            out = jnp.where(col < c_out_valid, out, -1e30)
            m = jnp.max(out, axis=-1, keepdims=True)
            z = out - m
            lse = jnp.log(jnp.sum(jnp.exp(z), axis=-1, keepdims=True))
            out = z - lse
        o_ref[...] = out.astype(o_ref.dtype)


# ---------------------------------------------------------------------------
# Wrappers
# ---------------------------------------------------------------------------

def sage_project(x_p, w_cat, b_cat, *, tm):
    """p = x_p @ w_cat + b_cat, tiled over rows. Output bf16, lane-dense."""
    n_pad, c_in_p = x_p.shape
    c2 = w_cat.shape[1]
    flops = 2 * n_pad * c_in_p * c2
    bytes_accessed = (n_pad * c_in_p * 2 + c_in_p * c2 * 2 + c2 * 4 + n_pad * c2 * 2)
    return pl.pallas_call(
        _proj_kernel,
        out_shape=jax.ShapeDtypeStruct((n_pad, c2), jnp.bfloat16),
        grid_spec=pltpu.PrefetchScalarGridSpec(
            num_scalar_prefetch=0,
            grid=(n_pad // tm,),
            in_specs=[
                pl.BlockSpec((tm, c_in_p), lambda i: (i, 0)),        # x row tile
                pl.BlockSpec((c_in_p, c2), lambda i: (0, 0),
                             pipeline_mode=pl.Buffered(1)),          # [W_l | W_r] (resident)
                pl.BlockSpec((1, c2), lambda i: (0, 0),
                             pipeline_mode=pl.Buffered(1)),          # [0 | b]     (resident)
            ],
            out_specs=pl.BlockSpec((tm, c2), lambda i: (i, 0)),
        ),
        compiler_params=pltpu.CompilerParams(
            dimension_semantics=("parallel",),
            vmem_limit_bytes=_VMEM_LIMIT,
        ),
        cost_estimate=pl.CostEstimate(
            flops=int(flops), transcendentals=0,
            bytes_accessed=int(bytes_accessed)),
    )(x_p, w_cat, b_cat)


def sage_aggregate(a_i8, p, inv_deg, *, c_out_pad, activation, c_out_valid,
                   out_dtype, tm, tk, yl_resident):
    """out = inv_deg * (A_cnt @ p[:, :Cp]) + p[rows, Cp:], K-tiled, fused epilogue."""
    n_pad = a_i8.shape[0]
    grid = (n_pad // tm, n_pad // tk)

    if yl_resident:
        # Full x@W_l panel: constant index map -> DMA'd once and kept resident;
        # single-buffered so it is not allocated twice in VMEM.
        yl_spec = pl.BlockSpec((n_pad, c_out_pad), lambda i, k: (0, 0),
                               pipeline_mode=pl.Buffered(1))
    else:
        yl_spec = pl.BlockSpec((tk, c_out_pad), lambda i, k: (k, 0))

    kernel = functools.partial(_agg_kernel, activation=activation,
                               c_out_valid=c_out_valid, tk=tk,
                               yl_resident=yl_resident)

    flops = 2 * n_pad * n_pad * c_out_pad
    transcend = n_pad * c_out_pad if activation == "log_softmax" else 0
    yl_reads = 1 if yl_resident else n_pad // tm
    bytes_accessed = (n_pad * n_pad * 1                          # int8 A
                      + yl_reads * n_pad * c_out_pad * 2         # x@W_l
                      + n_pad * c_out_pad * 2                    # x@W_r + b
                      + n_pad * 4                                # 1/deg
                      + n_pad * c_out_pad * jnp.dtype(out_dtype).itemsize)

    return pl.pallas_call(
        kernel,
        out_shape=jax.ShapeDtypeStruct((n_pad, c_out_pad), out_dtype),
        grid_spec=pltpu.PrefetchScalarGridSpec(
            num_scalar_prefetch=0,
            grid=grid,
            in_specs=[
                pl.BlockSpec((tm, tk), lambda i, k: (i, k)),          # A block (int8)
                yl_spec,                                              # x@W_l
                pl.BlockSpec((tm, c_out_pad), lambda i, k: (i, 1),
                             pipeline_mode=pl.Buffered(1)),           # x@W_r + b rows
                pl.BlockSpec((tm, 1), lambda i, k: (i, 0)),           # 1/in_degree
            ],
            out_specs=pl.BlockSpec((tm, c_out_pad), lambda i, k: (i, 0)),
            scratch_shapes=[pltpu.VMEM((tm, c_out_pad), jnp.float32)],
        ),
        compiler_params=pltpu.CompilerParams(
            dimension_semantics=("parallel", "arbitrary"),
            vmem_limit_bytes=_VMEM_LIMIT,
        ),
        cost_estimate=pl.CostEstimate(
            flops=int(flops), transcendentals=int(transcend),
            bytes_accessed=int(bytes_accessed)),
    )(a_i8, p, p, inv_deg)


def build_graph_inputs(edge_index, num_nodes, n_pad):
    """int8 edge-count adjacency A[dst, src] (padded shape) and f32 1/in_degree.

    Built ONCE outside the forward. Mean aggregation == inv_deg * (A @ x);
    padded rows/cols are zero, isolated nodes aggregate to 0 (matching PyG).
    """
    src, dst = edge_index[0], edge_index[1]
    counts = jnp.zeros((n_pad, n_pad), jnp.int32).at[dst, src].add(1)
    deg = jnp.sum(counts, axis=1, keepdims=True).astype(jnp.float32)
    inv_deg = 1.0 / jnp.maximum(deg, 1.0)
    a_i8 = jnp.clip(counts, 0, 127).astype(jnp.int8)
    return a_i8, inv_deg


def init_sage_params(key, in_channels, hidden_channels, out_channels, num_layers):
    """Deterministic parameter init. Each layer: (W_l, W_r, bias)."""
    dims = [in_channels] + [hidden_channels] * (num_layers - 1) + [out_channels]
    params = []
    for layer in range(num_layers):
        c_in, c_out = dims[layer], dims[layer + 1]
        key, k1, k2 = jax.random.split(key, 3)
        scale = 1.0 / jnp.sqrt(jnp.float32(c_in))
        w_l = jax.random.uniform(k1, (c_in, c_out), jnp.float32, -scale, scale)
        w_r = jax.random.uniform(k2, (c_in, c_out), jnp.float32, -scale, scale)
        bias = jnp.zeros((1, c_out), jnp.float32)
        params.append((w_l, w_r, bias))
    return params


def sage_forward(x, a_i8, inv_deg, params, *, dropout_p=0.5):
    """Forward pass of SAGE (eval mode: dropout is identity)."""
    del dropout_p  # TODO(synk): dropout only matters in training; eval == identity
    n, c_in = x.shape
    n_pad = a_i8.shape[0]
    assert n_pad % LANE == 0 and a_i8.shape == (n_pad, n_pad) and n_pad >= n
    assert inv_deg.shape == (n_pad, 1)

    tm, tk = _pick_tiles(n_pad)

    h = _pad2d(x, n_pad, _round_up(c_in, LANE)).astype(jnp.bfloat16)

    num_layers = len(params)
    for li, (w_l, w_r, b) in enumerate(params):
        c_in_l, c_out_l = w_l.shape
        c_in_p = _round_up(c_in_l, LANE)
        c_out_p = _round_up(c_out_l, LANE)

        # Stacked, lane-padded weights/bias (host-side, once per layer).
        w_cat = jnp.concatenate(
            [_pad2d(w_l, c_in_p, c_out_p), _pad2d(w_r, c_in_p, c_out_p)], axis=1
        ).astype(jnp.bfloat16)
        b_pad = _pad2d(b.reshape(1, -1), 1, c_out_p).astype(jnp.float32)
        b_cat = jnp.concatenate([jnp.zeros_like(b_pad), b_pad], axis=1)

        # NOTE: padded rows of h pick up relu(bias) through the W_r branch;
        # this is safe because A's padded columns are all-zero (padded rows
        # never leak into real rows) and padding is sliced off at the end.
        p = sage_project(h, w_cat, b_cat, tm=tm)

        is_last = li == num_layers - 1
        yl_resident = n_pad * c_out_p * 2 <= _YL_RESIDENT_BYTES
        h = sage_aggregate(
            a_i8, p, inv_deg,
            c_out_pad=c_out_p,
            activation="log_softmax" if is_last else "relu",
            c_out_valid=c_out_l,
            out_dtype=jnp.float32 if is_last else jnp.bfloat16,
            tm=tm, tk=tk, yl_resident=yl_resident,
        )

    out_channels = params[-1][0].shape[1]
    return h[:n, :out_channels]


# ---------------------------------------------------------------------------
# Reference (pure JAX, mirroring the kernel's bf16-operand / f32-acc numerics)
# ---------------------------------------------------------------------------

def sage_forward_ref(x, edge_index, params):
    n = x.shape[0]
    src, dst = edge_index[0], edge_index[1]
    a = jnp.zeros((n, n), jnp.float32).at[dst, src].add(1.0)
    inv_deg = 1.0 / jnp.maximum(jnp.sum(a, axis=1, keepdims=True), 1.0)
    a = a.astype(jnp.bfloat16)  # small exact integer counts
    h = x.astype(jnp.bfloat16)
    num_layers = len(params)
    out = None
    for li, (w_l, w_r, b) in enumerate(params):
        wl = w_l.astype(jnp.bfloat16)
        wr = w_r.astype(jnp.bfloat16)
        yl = jnp.dot(h, wl, preferred_element_type=jnp.float32).astype(jnp.bfloat16)
        yr = (jnp.dot(h, wr, preferred_element_type=jnp.float32) + b).astype(jnp.bfloat16)
        agg = jnp.dot(a, yl, preferred_element_type=jnp.float32)
        o = agg * inv_deg + yr.astype(jnp.float32)
        if li < num_layers - 1:
            h = jnp.maximum(o, 0.0).astype(jnp.bfloat16)
        else:
            out = jax.nn.log_softmax(o, axis=-1)
    return out


# ---------------------------------------------------------------------------
# Main
# ---------------------------------------------------------------------------

if __name__ == "__main__":
    num_nodes = 64
    num_edges = 256
    in_channels = 32
    hidden_channels = 32
    out_channels = 16
    num_layers = 3
    dropout = 0.5  # eval mode -> identity

    key = jax.random.PRNGKey(0)
    k_x, k_src, k_dst, k_par = jax.random.split(key, 4)

    x = jax.random.normal(k_x, (num_nodes, in_channels), jnp.float32)
    src = jax.random.randint(k_src, (num_edges,), 0, num_nodes, jnp.int32)
    dst = jax.random.randint(k_dst, (num_edges,), 0, num_nodes, jnp.int32)
    edge_index = jnp.stack([src, dst], axis=0)

    params = init_sage_params(
        k_par, in_channels, hidden_channels, out_channels, num_layers
    )

    # Graph structure built once, at padded shape / target dtype, outside the forward.
    n_pad = _round_up(num_nodes, LANE)
    a_i8, inv_deg = build_graph_inputs(edge_index, num_nodes, n_pad)

    out = sage_forward(x, a_i8, inv_deg, params, dropout_p=dropout)
    out = jax.block_until_ready(out)

    ref = sage_forward_ref(x, edge_index, params)
    assert out.shape == (num_nodes, out_channels)
    assert jnp.allclose(out, ref, atol=1e-2, rtol=1e-2), "mismatch vs JAX reference"

    print("KERNEL_OK")
</pallas_src>

<mosaic_0001>
module attributes {stable_mosaic.version = 11 : i64} {
  func.func @_proj_kernel(%arg0: i32, %arg1: memref<32x128xbf16, #tpu.memory_space<vmem>>, %arg2: memref<128x256xbf16, #tpu.memory_space<vmem>>, %arg3: memref<1x256xf32, #tpu.memory_space<vmem>>, %arg4: memref<32x256xbf16, #tpu.memory_space<vmem>>) attributes {dimension_semantics = [#tpu.dimension_semantics<parallel>], iteration_bounds = array<i64: 4>, scalar_prefetch = 0 : i64, scratch_operands = 0 : i64, tpu.core_type = #tpu.core_type<tc>, window_params = [{transform_indices = @transform_0, window_bounds = array<i64: 32, 128>}, {pipeline_mode = #tpu.pipeline_mode<synchronous>, transform_indices = @transform_1, window_bounds = array<i64: 128, 256>}, {pipeline_mode = #tpu.pipeline_mode<synchronous>, transform_indices = @transform_2, window_bounds = array<i64: 1, 256>}, {transform_indices = @transform_3, window_bounds = array<i64: 32, 256>}]} {
    %c0 = arith.constant 0 : index
    %c0_0 = arith.constant 0 : index
    %0 = vector.load %arg1[%c0, %c0_0] : memref<32x128xbf16, #tpu.memory_space<vmem>>, vector<32x128xbf16>
    %c0_1 = arith.constant 0 : index
    %c0_2 = arith.constant 0 : index
    %1 = vector.load %arg2[%c0_1, %c0_2] : memref<128x256xbf16, #tpu.memory_space<vmem>>, vector<128x256xbf16>
    %cst = arith.constant dense<0.000000e+00> : vector<32x256xf32>
    %2 = tpu.matmul %0, %1, %cst {dimension_numbers = #tpu.dot_dimension_numbers<[1], [0], [0], [1], [0, 0, 1, 1], [], []>} : vector<32x128xbf16>, vector<128x256xbf16>, vector<32x256xf32> -> vector<32x256xf32>
    %c0_3 = arith.constant 0 : index
    %c0_4 = arith.constant 0 : index
    %3 = vector.load %arg3[%c0_3, %c0_4] : memref<1x256xf32, #tpu.memory_space<vmem>>, vector<1x256xf32>
    %4 = vector.broadcast %3 : vector<1x256xf32> to vector<32x256xf32>
    %5 = arith.addf %2, %4 : vector<32x256xf32>
    %6 = arith.truncf %5 : vector<32x256xf32> to vector<32x256xbf16>
    %c0_5 = arith.constant 0 : index
    %c0_6 = arith.constant 0 : index
    %7 = vector.load %arg4[%c0_5, %c0_6] : memref<32x256xbf16, #tpu.memory_space<vmem>>, vector<32x256xbf16>
    tpu.vector_store %arg4[%c0_5, %c0_6], %6 {strides = array<i32>} : memref<32x256xbf16, #tpu.memory_space<vmem>>, vector<32x256xbf16>,
    return
  }
  func.func @transform_0(%arg0: i32) -> (i32, i32) {
    %c0_i32 = arith.constant 0 : i32
    %c0_i32_0 = arith.constant 0 : i32
    return %arg0, %c0_i32 : i32, i32
  }
  func.func @transform_1(%arg0: i32) -> (i32, i32) {
    %c0_i32 = arith.constant 0 : i32
    %c0_i32_0 = arith.constant 0 : i32
    %c0_i32_1 = arith.constant 0 : i32
    return %c0_i32, %c0_i32_0 : i32, i32
  }
  func.func @transform_2(%arg0: i32) -> (i32, i32) {
    %c0_i32 = arith.constant 0 : i32
    %c0_i32_0 = arith.constant 0 : i32
    %c0_i32_1 = arith.constant 0 : i32
    return %c0_i32, %c0_i32_0 : i32, i32
  }
  func.func @transform_3(%arg0: i32) -> (i32, i32) {
    %c0_i32 = arith.constant 0 : i32
    %c0_i32_0 = arith.constant 0 : i32
    return %arg0, %c0_i32 : i32, i32
  }
}

</mosaic_0001>

<bundles_post_ra>
// kernel: tpu_custom_call.1
= control target key start
LH: loop header
LB: loop body
LE: loop exit
PB: predicated region body
PF: predicated region fallthrough
CT: control target
= control target key end

     0   :  { %8 = vsyncpa [#allocation3], 0  ;;  %s1022_s0 = inlined_call_operand.hbm [shape: bf16[128,128], index: 0, kind: input, shape index: {}]   ;;  %s1023_s1 = inlined_call_operand.hbm [shape: bf16[128,256], index: 1, kind: input, shape index: {}]   ;;  %s1024_s2 = inlined_call_operand.vmem [shape: f32[1,256], index: 2, kind: input, shape index: {}]   ;;  %s1025_s3 = inlined_call_operand.hbm [shape: bf16[128,256], index: 3, kind: output, shape index: {}]  }
   0x1   :  { %10 = vsyncpa [#allocation3 + $0x1], 0 }
   0x2   :  { %11 = vsyncpa [#allocation6], 0 }
   0x3   :  { %12 = vsyncpa [#allocation4], 0 }
   0x4   :  { %14 = vsyncpa [#allocation4 + $0x1], 0  ;;  %s822_s12 = smov 0   ;;  %s824_s13 = smov 0  }
   0x5   :  { %s826_s14 = smov 0   ;;  %s828_s15 = smov 0  }
   0x6 LB: > { %s843_s16 = sadd.s32 4294967295, %s790_s15   ;;  %s510_s17 = sadd.s32 4294967294, %s790_s15   ;;  %s790_s15 = sphi %s828_s15, %s1044_s15   ;;  %s786_s14 = sphi %s826_s14, %s1043_s14   ;;  %s782_s13 = sphi %s824_s13, %s1042_s13   ;;  %s778_s12 = sphi %s822_s12, %s1041_s12  }
   0x7   : > { %p40_p0 = scmp.ne.s32.totalorder %s782_s13, %s778_s12  ;;  %p1026_p1 = scmp.eq.s32.totalorder %s843_s16, 0 }
   0x8   : > { %p112_p3 = scmp.eq.s32.totalorder %s510_s17, 3  ;;  %p511_p5 = scmp.ge.s32.totalorder %s790_s15, 1 }
   0x9   : > { %p852_p4 = por %p1026_p1, %p40_p0  ;;  %p119_p7 = scmp.lt.s32.totalorder %s790_s15, 5 }
   0xa   : > { %p857_p6 = por %p112_p3, %p40_p0  ;;  %s792_s21 = smov [#allocation5]  }
   0xb   : > { %s1029_s18 = scalar_select %p852_p4, 1, 0 }
   0xc   : > { %s1030_s19 = scalar_select %p857_p6, 1, 0 }
   0xd   : > { %p862_p8 = pnand %p511_p5, %p119_p7  ;;  %s131_s22 = sshll.u32 %s792_s21, 4  ;;  %s132_s22 = int_to_ptr.vmem [resolvable:$true] %s131_s22 }
   0xe   : > { %s875_s24 = sadd.s32 1, %s790_s15   ;;  %s27_s25 = sadd.s32 1, %s786_s14 }
   0xf   : > { %s1031_s20 = scalar_select %p862_p8, 1, 0 }
  0x10   : > { %p580_p9 = pneg %p862_p8  ;;  %s24_s26 = ssub.s32 %s790_s15, %s875_s24 }
  0x11   : > { %s662_s29 = scalar_lea.hbm %s1023_s1, 2048 }
  0x12   : > { %p870_p10 = pnand %p580_p9, %p1026_p1  ;;  %p663_p11 = scmp.ne.s32.totalorder %s1023_s1, %s662_s29 }
  0x13   : > { %p669_p3 = scmp.lt.u32.totalorder %s662_s29, %s1023_s1 }
  0x14   : > { %p664_p12 = pneg %p870_p10 }
  0x16   : > { %p665_p13 = pnand %p664_p12, %p663_p11 }
  0x18   : > { %p666_p0 = pneg %p665_p13 }
  0x1a   : > { %p671_p5 = pnand %p669_p3, %p666_p0 }
  0x1c   : > { %674 = shalt.err (!%p671_p5)
}
  0x1d   : > { %s675_s7 = scalar_lea.vmem %s132_s22, 2048  ;;  %p683_p2 = scmp.lt.s32.totalorder %s132_s22, %s132_s22 }
  0x1e   : > { %p676_p7 = scmp.ne.s32.totalorder %s132_s22, %s675_s7  ;;  %p684_p6 = scmp.lt.s32.totalorder %s675_s7, %s675_s7 }
  0x20   : > { %p678_p9 = pnand %p676_p7, %p664_p12  ;;  %p685_p4 = por %p684_p6, %p683_p2 }
  0x22   : > { %p679_p1 = pneg %p678_p9 }
  0x24   : > { %p686_p8 = pnand %p685_p4, %p679_p1 }
  0x26   : > { %689 = shalt.err (!%p686_p8)
}
  0x27   : > { %s793_s8 = smov 128   ;;  %s794_s9 = smov 8  }
  0x28   : > { %583 = dma.hbm_to_vmem [thread:$0]  (!%p870_p10), %s1023_s1, 2048, %s132_s22, [#allocation6], %s793_s8, %s793_s8, %s794_s9  }
  0x29   : > { %p25_p11 = scmp.eq.s32.totalorder %s24_s26, 0  ;;  %p34_p2 = scmp.ne.s32.totalorder %s786_s14, %s782_s13 }
  0x2a   : > { %p35_p1 = scmp.eq.s32.totalorder %s790_s15, 0  ;;  %p593_p4 = scmp.lt.s32.totalorder %s790_s15, 4 }
  0x2b   : > { %s901_s17 = scalar_select %p25_p11, %s786_s14, %s27_s25  }
  0x2c   : > { %p36_p6 = por %p35_p1, %p34_p2  ;;  %p1033_p8 = scmp.eq.s32.totalorder %s843_s16, 3 }
  0x2d   : > { %s148_s27 = sand.u32 1, %s786_s14   ;;  %s549_s28 = sshll.u32 %s790_s15, 8 }
  0x2e   : > { %p905_p12 = por %p1033_p8, %p34_p2  ;;  %s514_s29 = sshll.u32 %s148_s27, 4 }
  0x2f   : > { %s914_s4 = scalar_lea.hbm %s1022_s0, %s549_s28  ;;  %s152_s22 = scalar_lea.vmem [#allocation2], %s514_s29 }
  0x30   : > { %s159_s25 = sshll.u32 %s152_s22, 4  ;;  %p916_p10 = pnand %p593_p4, %p36_p6  ;;  %s920_s25 = int_to_ptr.vmem [resolvable:$true] %s159_s25 }
  0x31   : > { %s922_s5 = scalar_lea.sflag [#allocation3], %s148_s27  ;;  %s690_s6 = scalar_lea.hbm %s914_s4, 256 }
  0x32   : > { %p691_p13 = scmp.ne.s32.totalorder %s914_s4, %s690_s6  ;;  %p692_p0 = pneg %p916_p10 }
  0x33   : > { %s695_s9 = scalar_lea.hbm %s1022_s0, 1024  ;;  %p696_p7 = scmp.lt.u32.totalorder %s914_s4, %s1022_s0 }
  0x34   : > { %p693_p3 = pnand %p692_p0, %p691_p13  ;;  %p697_p9 = scmp.lt.u32.totalorder %s695_s9, %s690_s6 }
  0x35   : > { %p699_p2 = scmp.lt.u32.totalorder %s690_s6, %s914_s4 }
  0x36   : > { %p694_p5 = pneg %p693_p3  ;;  %p698_p11 = por %p697_p9, %p696_p7 }
  0x38   : > { %p700_p1 = por %p699_p2, %p698_p11 }
  0x3a   : > { %p701_p4 = pnand %p700_p1, %p694_p5 }
  0x3c   : > { %704 = shalt.err (!%p701_p4)
}
  0x3d   : > { %s705_s27 = scalar_lea.vmem %s920_s25, 256  ;;  %s795_s28 = smov [#allocation2]  }
  0x3e   : > { %p706_p6 = scmp.ne.s32.totalorder %s920_s25, %s705_s27  ;;  %s710_s29 = sshll.u32 %s795_s28, 4  ;;  %s711_s29 = int_to_ptr.vmem [resolvable:$false] %s710_s29 }
  0x3f   : > { %s712_s23 = scalar_lea.vmem %s711_s29, 512  ;;  %p713_p3 = scmp.lt.s32.totalorder %s920_s25, %s711_s29 }
  0x40   : > { %p708_p8 = pnand %p706_p6, %p692_p0  ;;  %p714_p7 = scmp.lt.s32.totalorder %s712_s23, %s705_s27 }
  0x42   : > { %p709_p13 = pneg %p708_p8  ;;  %p715_p9 = por %p714_p7, %p713_p3 }
  0x44   : > { %p716_p11 = pnand %p715_p9, %p709_p13 }
  0x46   : > { %719 = shalt.err (!%p716_p11)
}
  0x47   : > { %s796_s30 = smov 64   ;;  %s797_s22 = smov 4  }
  0x48   : > { %587 = dma.hbm_to_vmem [thread:$0]  (!%p916_p10), %s914_s4, 256, %s920_s25, %s922_s5, %s796_s30, %s796_s30, %s797_s22  }
  0x49   : > { %p1036_p0 = scmp.ne.s32.totalorder %s1031_s20, 0 }
  0x4a   : > { %s953_s6 = sand.u32 (!%p1036_p0), 1, %s782_s13   ;;  %p1037_p5 = scmp.ne.s32.totalorder (!%p1036_p0), %s1029_s18, 0 }
  0x4b   : > { %171 = sbr.rel (%p1036_p0) target bundleno = 354 (0x162), region = 32  ;;  %s518_s7 = sshll.u32 (!%p1036_p0), %s953_s6, 4 }
  0x4c   : > { %s174_s8 = scalar_lea.sflag (!%p1036_p0), [#allocation3], %s953_s6  ;;  %s957_s9 = scalar_lea.vmem (!%p1036_p0), [#allocation2], %s518_s7 }
  0x52   : > { %765 = dma.done.wait (%p1037_p5), %s174_s8, 256  }
  0x53   : > { %767 = vsyncadd (%p1037_p5), %s174_s8, 4294967040  ;;  %p1038_p10 = scmp.eq.s32.totalorder %s843_s16, 0 }
  0x55   : > { %769 = dma.done.wait (%p1038_p10), [#allocation6], 2048   ;;  %p1039_p2 = pmov %p1038_p10 }
  0x56   : > { %v798_v0 = vmov 0   ;;  %v636_v1 = vld [vmem:[#allocation5 + $0x4] ss:$8 sps:$4 sm:$0xff]   ;;  %v638_v2 = vld [vmem:[#allocation5] ss:$8 sps:$4 sm:$0xff]   ;;  %v229_v19 = vlaneseq  ;;  %s520_s4 = sshll.u32 %s953_s6, 5 }
  0x57   : > { %771 = vsyncadd (%p1039_p2), [#allocation6], 4294965248  ;;  %363 = vmatprep.mubr.bf16.mxu0 %v798_v0  ;;  %373 = vmatprep.mubr.bf16.mxu1 %v798_v0  ;;  %v639_v3 = vld [vmem:[#allocation5 + $0x14] ss:$8 sps:$4 sm:$0xff]   ;;  %v641_v4 = vld [vmem:[#allocation5 + $0x10] ss:$8 sps:$4 sm:$0xff]  }
  0x58   : > { %331 = vmatprep.subr.bf16.mxu0 %v636_v1  ;;  %556 = vmatprep.subr.bf16.mxu1 %v636_v1  ;;  %v642_v5 = vld [vmem:[#allocation5 + $0x24] ss:$8 sps:$4 sm:$0xff]   ;;  %v644_v6 = vld [vmem:[#allocation5 + $0x20] ss:$8 sps:$4 sm:$0xff]   ;;  %v645_v7 = vld [vmem:[#allocation5 + $0x34] ss:$8 sps:$4 sm:$0xff]  }
  0x59   : > { %332 = vmatpush1.bf16.msra.mxu0 %v638_v2  ;;  %564 = vmatpush1.bf16.msra.mxu1 %v638_v2  ;;  %v647_v8 = vld [vmem:[#allocation5 + $0x30] ss:$8 sps:$4 sm:$0xff]   ;;  %v648_v9 = vld [vmem:[#allocation5 + $0x44] ss:$8 sps:$4 sm:$0xff]   ;;  %v650_v10 = vld [vmem:[#allocation5 + $0x40] ss:$8 sps:$4 sm:$0xff]  }
  0x5a   : > { %333 = vmatprep.subr.bf16.mxu0 %v639_v3  ;;  %557 = vmatprep.subr.bf16.mxu1 %v639_v3  ;;  %v651_v11 = vld [vmem:[#allocation5 + $0x54] ss:$8 sps:$4 sm:$0xff]   ;;  %v653_v12 = vld [vmem:[#allocation5 + $0x50] ss:$8 sps:$4 sm:$0xff]   ;;  %v654_v13 = vld [vmem:[#allocation5 + $0x64] ss:$8 sps:$4 sm:$0xff]  }
  0x5b   : > { %v656_v14 = vld [vmem:[#allocation5 + $0x60] ss:$8 sps:$4 sm:$0xff]   ;;  %v657_v15 = vld [vmem:[#allocation5 + $0x74] ss:$8 sps:$4 sm:$0xff]   ;;  %v659_v16 = vld [vmem:[#allocation5 + $0x70] ss:$8 sps:$4 sm:$0xff]  }
  0x5c   : > { %v660_v17 = vld [vmem:[%s957_s9] sm:$0xff]   ;;  %v661_v18 = vld [vmem:[%s957_s9 + $0x8] sm:$0xff]   ;;  %v230_v20 = vshrl.u32 %v229_v19, 7  ;;  %s203_s25 = scalar_lea.vmem [#allocation7], %s520_s4  ;;  %s555_s5 = sshll.u32 %s843_s16, 9 }
  0x5d   : > { %334 = vmatpush1.bf16.msra.mxu0 %v641_v4  ;;  %565 = vmatpush1.bf16.msra.mxu1 %v641_v4  ;;  %v227_v22 = vld [vmem:[%s1024_s2] sm:$0x3]  ;;  %s427_s26 = sshll.u32 %s203_s25, 4  ;;  %s979_s27 = scalar_lea.hbm %s1025_s3, %s555_s5  ;;  %s974_s26 = int_to_ptr.vmem [resolvable:$true] %s427_s26 }
  0x5e   : > { %335 = vmatprep.subr.bf16.mxu0 %v642_v5  ;;  %558 = vmatprep.subr.bf16.mxu1 %v642_v5  ;;  %v231_v21 = vsub.s32 0, %v230_v20  ;;  %v235_v23 = vsub.s32 1, %v230_v20  ;;  %s413_s16 = scalar_lea.sflag [#allocation4], %s953_s6  ;;  %s720_s28 = scalar_lea.vmem %s974_s26, 512 }
  0x5f   : > { %p721_p1 = scmp.ne.s32.totalorder %s974_s26, %s720_s28  ;;  %s799_s29 = smov [#allocation7]  }
  0x60   : > { %v232_v24 = vrot.slane %v227_v22, %v231_v21  ;;  %v236_v25 = vrot.slane %v227_v22, %v235_v23  ;;  %s724_s23 = sshll.u32 %s799_s29, 4  ;;  %s725_s23 = int_to_ptr.vmem [resolvable:$false] %s724_s23 }
  0x61   : > { %336 = vmatpush1.bf16.msra.mxu0 %v644_v6  ;;  %566 = vmatpush1.bf16.msra.mxu1 %v644_v6  ;;  %p722_p4 = pnand %p721_p1, %p905_p12  ;;  %s726_s30 = scalar_lea.vmem %s725_s23, 1024 }
  0x62   : > { %337 = vmatprep.subr.bf16.mxu0 %v645_v7  ;;  %559 = vmatprep.subr.bf16.mxu1 %v645_v7  ;;  %p727_p8 = scmp.lt.s32.totalorder %s974_s26, %s725_s23  ;;  %p728_p13 = scmp.lt.s32.totalorder %s726_s30, %s720_s28 }
  0x63   : > { %p723_p6 = pneg %p722_p4 }
  0x64   : > { %p729_p3 = por %p728_p13, %p727_p8 }
  0x65   : > { %338 = vmatpush1.bf16.msra.mxu0 %v647_v8  ;;  %567 = vmatpush1.bf16.msra.mxu1 %v647_v8 }
  0x66   : > { %339 = vmatprep.subr.bf16.mxu0 %v648_v9  ;;  %560 = vmatprep.subr.bf16.mxu1 %v648_v9  ;;  %p730_p7 = pnand %p729_p3, %p723_p6 }
  0x69   : > { %340 = vmatpush1.bf16.msra.mxu0 %v650_v10  ;;  %568 = vmatpush1.bf16.msra.mxu1 %v650_v10 }
  0x6a   : > { %341 = vmatprep.subr.bf16.mxu0 %v651_v11  ;;  %561 = vmatprep.subr.bf16.mxu1 %v651_v11 }
  0x6d   : > { %342 = vmatpush1.bf16.msra.mxu0 %v653_v12  ;;  %569 = vmatpush1.bf16.msra.mxu1 %v653_v12 }
  0x6e   : > { %343 = vmatprep.subr.bf16.mxu0 %v654_v13  ;;  %562 = vmatprep.subr.bf16.mxu1 %v654_v13 }
  0x71   : > { %344 = vmatpush1.bf16.msra.mxu0 %v656_v14  ;;  %570 = vmatpush1.bf16.msra.mxu1 %v656_v14 }
  0x72   : > { %345 = vmatprep.subr.bf16.mxu0 %v657_v15  ;;  %563 = vmatprep.subr.bf16.mxu1 %v657_v15 }
  0x75   : > { %346 = vmatpush1.bf16.msra.mxu0 %v659_v16  ;;  %571 = vmatpush1.bf16.msra.mxu1 %v659_v16 }
  0x78   : > { %364 = vmatmul.mubr.bf16.vlgmr.msra.gmra.mrb[0].mxu0 %v660_v17  ;;  %374 = vmatmul.mubr.bf16.vlgmr.msra.gmra.mrb[0].mxu1 %v661_v18 }
 0x14b   : > { %v365_v26 = vpop.f32.mrb[0].mxu0  ;;  %v375_v27 = vpop.f32.mrb[0].mxu1 }
 0x14c   : > { %v366_v28 = vadd.f32 %v365_v26, %v232_v24  ;;  %v376_v29 = vadd.f32 %v375_v27, %v232_v24  ;;  %v367_v30 = vpop.f32.mrb[1].mxu0  ;;  %v377_v31 = vpop.f32.mrb[1].mxu1 }
 0x14d   : > { %v368_v32 = vadd.f32 %v367_v30, %v236_v25  ;;  %v378_v33 = vadd.f32 %v377_v31, %v236_v25  ;;  %v369_v34 = vpop.f32.mrb[2].mxu0  ;;  %v379_v35 = vpop.f32.mrb[2].mxu1 }
 0x14e   : > { %v370_v36 = vadd.f32 %v369_v34, %v232_v24  ;;  %v380_v37 = vadd.f32 %v379_v35, %v232_v24  ;;  %v371_v38 = vpop.f32.mrb[3].mxu0  ;;  %v381_v39 = vpop.f32.mrb[3].mxu1 }
 0x14f   : > { %v550_v40 = vpack.c.bf16 %v368_v32, %v366_v28  ;;  %v552_v41 = vpack.c.bf16 %v378_v33, %v376_v29  ;;  %v372_v42 = vadd.f32 %v371_v38, %v236_v25  ;;  %v382_v43 = vadd.f32 %v381_v39, %v236_v25 }
 0x151   : > { %408 = vst [vmem:[%s203_s25] sm:$0xff] %v550_v40  ;;  %410 = vst [vmem:[%s203_s25 + $0x10] sm:$0xff] %v552_v41  ;;  %v551_v44 = vpack.c.bf16 %v372_v42, %v370_v36  ;;  %v553_v45 = vpack.c.bf16 %v382_v43, %v380_v37 }
 0x153   : > { %409 = vst [vmem:[%s203_s25 + $0x8] sm:$0xff] %v551_v44  ;;  %411 = vst [vmem:[%s203_s25 + $0x18] sm:$0xff] %v553_v45 }
 0x154   : > { %733 = shalt.err (!%p730_p7)
}
 0x155   : > { %s734_s22 = scalar_lea.hbm %s979_s27, 512  ;;  %s738_s9 = scalar_lea.hbm %s1025_s3, 2048 }
 0x156   : > { %p735_p9 = scmp.ne.s32.totalorder %s979_s27, %s734_s22  ;;  %p739_p5 = scmp.lt.u32.totalorder %s979_s27, %s1025_s3 }
 0x157   : > { %p740_p10 = scmp.lt.u32.totalorder %s738_s9, %s734_s22  ;;  %p742_p1 = scmp.lt.u32.totalorder %s734_s22, %s979_s27 }
 0x158   : > { %p736_p11 = pnand %p735_p9, %p905_p12 }
 0x159   : > { %p741_p2 = por %p740_p10, %p739_p5 }
 0x15a   : > { %p737_p0 = pneg %p736_p11 }
 0x15b   : > { %p743_p4 = por %p742_p1, %p741_p2 }
 0x15d   : > { %p744_p6 = pnand %p743_p4, %p737_p0 }
 0x15f   : > { %747 = shalt.err (!%p744_p6)
}
 0x160   : > { %s800_s4 = smov 128   ;;  %s801_s25 = smov 8  }
 0x161   : > { %578 = dma.vmem_to_hbm [thread:$0]  (%p905_p12), %s974_s26, 512, %s979_s27, %s413_s16, %s800_s4, %s800_s4, %s801_s25  }
 0x162 PF: > { %p595_p8 = scmp.ge.s32.totalorder %s790_s15, 2  ;;  %s442_s5 = sand.u32 1, %s778_s12  }
 0x163   : > { %p1040_p13 = scmp.ne.s32.totalorder %s1030_s19, 0  ;;  %s443_s10 = scalar_lea.sflag [#allocation4], %s442_s5 }
 0x165   : > { %p589_p3 = pnand %p595_p8, %p1040_p13 }
 0x167   : > { %773 = dma.done.wait (!%p589_p3), %s443_s10, 512  }
 0x168   : > { %775 = vsyncadd (!%p589_p3), %s443_s10, 4294966784  ;;  %p17_p7 = scmp.ge.s32.totalorder %s875_s24, 6   ;;  %s1041_s12 = smov %s782_s13 }
 0x169   : > { %s1042_s13 = smov %s786_s14  ;;  %s1043_s14 = smov %s901_s17 }
 0x16a   : > { %s1044_s15 = smov %s875_s24  ;;  %19 = sbr.rel (!%p17_p7) target bundleno = 6 (0x6), region = 81 }
 0x171   :  { %448 = vsyncpa [#allocation3], 1 }
 0x172   :  { %450 = vsyncpa [#allocation3 + $0x1], 1 }
 0x173   :  { %451 = vsyncpa [#allocation6], 1 }
 0x174   :  { %452 = vsyncpa [#allocation4], 1 }
 0x175   :  { %454 = vsyncpa [#allocation4 + $0x1], 1 }

</bundles_post_ra>
